<compile_context>
chip_gen: v5e
topology: v5e:2x2
jax: 0.10.0
libtpu: 0.0.40
codegen_flags: <defaults>
</compile_context>

<pallas_src>
import functools

import jax
import jax.numpy as jnp
from jax.experimental import pallas as pl
from jax.experimental.pallas import tpu as pltpu

GN_EPS = 1e-5
_VMEM_LIMIT_BYTES = 32 * 1024 * 1024   # safe on v5e/v6e/v7x, leaves headroom


# --------------------------- fused (small / medium plane) path --------------

def _fused_kernel(x_ref, w_ref, b_ref, o_ref, *, inv_hw):
    # x_ref: (C, HW); w_ref / b_ref: (C, 1) folded per-channel scale / bias.
    x = x_ref[...].astype(jnp.float32)
    s = jnp.sum(x, axis=-1, keepdims=True)             # (C, 1)
    sq = jnp.sum(x * x, axis=-1, keepdims=True)        # (C, 1)
    mean = s * inv_hw
    var = sq * inv_hw - mean * mean
    a = jax.lax.rsqrt(var + GN_EPS) * w_ref[...]       # (C, 1)
    c = b_ref[...] - mean * a
    o_ref[...] = (x * jax.nn.sigmoid(x * a + c)).astype(o_ref.dtype)


# --------------------------- tiled (large feature map) path -----------------

def _stats_kernel(x_ref, w_ref, b_ref, a_ref, c_ref, sum_sc, sq_sc, *, inv_hw):
    t = pl.program_id(1)

    @pl.when(t == 0)
    def _():
        sum_sc[...] = jnp.zeros_like(sum_sc)
        sq_sc[...] = jnp.zeros_like(sq_sc)

    x = x_ref[...].astype(jnp.float32)                 # (C, T)
    sum_sc[...] += jnp.sum(x, axis=-1, keepdims=True)
    sq_sc[...] += jnp.sum(x * x, axis=-1, keepdims=True)

    @pl.when(t == pl.num_programs(1) - 1)
    def _():
        mean = sum_sc[...] * inv_hw
        var = sq_sc[...] * inv_hw - mean * mean
        a = jax.lax.rsqrt(var + GN_EPS) * w_ref[...]
        a_ref[...] = a
        c_ref[...] = b_ref[...] - mean * a


def _apply_kernel(x_ref, a_ref, c_ref, o_ref):
    x = x_ref[...].astype(jnp.float32)                 # (C, T)
    o_ref[...] = (x * jax.nn.sigmoid(x * a_ref[...] + c_ref[...])).astype(o_ref.dtype)


# --------------------------- wrapper ----------------------------------------

def sa_layer_forward(x_nhwc, gn_weight, gn_bias, sweight, sbias,
                     *, vmem_budget_bytes=16 * 1024 * 1024):
    """x_nhwc: (B, H, W, C) -> (B, H, W, C); matches PyTorch sa_layer.forward."""
    B, H, W, C = x_nhwc.shape
    HW = H * W
    inv_hw = 1.0 / float(HW)

    # Lane-dense view: channels on sublanes, spatial on the 128-lane dim.
    x3 = jnp.transpose(x_nhwc, (0, 3, 1, 2)).reshape(B, C, HW)

    # Fold GroupNorm affine and sweight/sbias into one per-channel scale/bias.
    w_eff = (gn_weight.astype(jnp.float32) * sweight.astype(jnp.float32)).reshape(C, 1)
    b_eff = (gn_bias.astype(jnp.float32) * sweight.astype(jnp.float32)
             + sbias.astype(jnp.float32)).reshape(C, 1)

    itemsize = x3.dtype.itemsize
    plane_bytes = C * HW * itemsize
    fused_fits = 4 * plane_bytes <= vmem_budget_bytes   # in + out, double-buffered

    # TODO(synk): handle HW not divisible by 128 with masked tail tiles instead
    # of falling back to the fused whole-plane path.
    if fused_fits or (HW % 128 != 0):
        param_spec = pl.BlockSpec((C, 1), lambda b: (0, 0))
        out3 = pl.pallas_call(
            functools.partial(_fused_kernel, inv_hw=inv_hw),
            out_shape=jax.ShapeDtypeStruct((B, C, HW), x3.dtype),
            grid_spec=pltpu.PrefetchScalarGridSpec(
                num_scalar_prefetch=0,
                grid=(B,),
                in_specs=[
                    pl.BlockSpec((None, C, HW), lambda b: (b, 0, 0)),
                    param_spec, param_spec,
                ],
                out_specs=pl.BlockSpec((None, C, HW), lambda b: (b, 0, 0)),
            ),
            compiler_params=pltpu.CompilerParams(
                dimension_semantics=("parallel",),
                vmem_limit_bytes=_VMEM_LIMIT_BYTES),
        )(x3, w_eff, b_eff)
    else:
        # Largest HW tile that is a multiple of 128, divides HW, and keeps the
        # double-buffered in+out tiles within the VMEM budget.
        n128 = HW // 128
        tile = 128
        for f in range(n128, 0, -1):
            if n128 % f == 0 and 4 * C * f * 128 * itemsize <= vmem_budget_bytes:
                tile = f * 128
                break
        nt = HW // tile

        param_spec = pl.BlockSpec((C, 1), lambda b, t: (0, 0))
        coef_spec = pl.BlockSpec((None, C, 1), lambda b, t: (b, 0, 0))
        x_spec = pl.BlockSpec((None, C, tile), lambda b, t: (b, 0, t))

        a_coef, c_coef = pl.pallas_call(
            functools.partial(_stats_kernel, inv_hw=inv_hw),
            out_shape=(jax.ShapeDtypeStruct((B, C, 1), jnp.float32),
                       jax.ShapeDtypeStruct((B, C, 1), jnp.float32)),
            grid_spec=pltpu.PrefetchScalarGridSpec(
                num_scalar_prefetch=0,
                grid=(B, nt),
                in_specs=[x_spec, param_spec, param_spec],
                out_specs=[coef_spec, coef_spec],
                scratch_shapes=[pltpu.VMEM((C, 1), jnp.float32),
                                pltpu.VMEM((C, 1), jnp.float32)],
            ),
            compiler_params=pltpu.CompilerParams(
                dimension_semantics=("parallel", "arbitrary"),
                vmem_limit_bytes=_VMEM_LIMIT_BYTES),
        )(x3, w_eff, b_eff)

        out3 = pl.pallas_call(
            _apply_kernel,
            out_shape=jax.ShapeDtypeStruct((B, C, HW), x3.dtype),
            grid_spec=pltpu.PrefetchScalarGridSpec(
                num_scalar_prefetch=0,
                grid=(B, nt),
                in_specs=[x_spec, coef_spec, coef_spec],
                out_specs=x_spec,
            ),
            compiler_params=pltpu.CompilerParams(
                dimension_semantics=("parallel", "parallel"),
                vmem_limit_bytes=_VMEM_LIMIT_BYTES),
        )(x3, a_coef, c_coef)

    return jnp.transpose(out3.reshape(B, C, H, W), (0, 2, 3, 1))


# --------------------------- plain-JAX reference ----------------------------

def sa_layer_reference(x_nhwc, gn_weight, gn_bias, sweight, sbias):
    """Reproduces the PyTorch forward (NCHW internally, NHWC in/out)."""
    x = jnp.transpose(x_nhwc, (0, 3, 1, 2)).astype(jnp.float32)
    mean = jnp.mean(x, axis=(2, 3), keepdims=True)
    var = jnp.mean((x - mean) ** 2, axis=(2, 3), keepdims=True)
    xs = (x - mean) / jnp.sqrt(var + GN_EPS)
    xs = xs * gn_weight.reshape(1, -1, 1, 1) + gn_bias.reshape(1, -1, 1, 1)
    xs = sweight.reshape(1, -1, 1, 1) * xs + sbias.reshape(1, -1, 1, 1)
    out = x * jax.nn.sigmoid(xs)
    return jnp.transpose(out, (0, 2, 3, 1))


if __name__ == "__main__":
    B, H, W, C = 2, 16, 16, 8
    key = jax.random.PRNGKey(0)
    kx, kg, kb, ks, kt = jax.random.split(key, 5)

    x = jax.random.normal(kx, (B, H, W, C), dtype=jnp.float32)
    # Non-trivial parameters so the GroupNorm path is numerically exercised
    # (the PyTorch default init sweight=0 would zero out the GN contribution).
    gn_weight = 1.0 + 0.1 * jax.random.normal(kg, (C,), dtype=jnp.float32)
    gn_bias = 0.1 * jax.random.normal(kb, (C,), dtype=jnp.float32)
    sweight = 1.0 + 0.1 * jax.random.normal(ks, (C,), dtype=jnp.float32)
    sbias = 0.1 * jax.random.normal(kt, (C,), dtype=jnp.float32)

    ref = sa_layer_reference(x, gn_weight, gn_bias, sweight, sbias)

    # Fused whole-plane path (default VMEM budget).
    out_fused = jax.block_until_ready(
        sa_layer_forward(x, gn_weight, gn_bias, sweight, sbias))
    assert out_fused.shape == (B, H, W, C)
    assert jnp.allclose(out_fused, ref, atol=1e-4, rtol=1e-4), "fused path mismatch"

    # Force the two-pass tiled path (HW=256 -> two 128-wide lane tiles).
    out_tiled = jax.block_until_ready(
        sa_layer_forward(x, gn_weight, gn_bias, sweight, sbias,
                         vmem_budget_bytes=16 * 1024))
    assert jnp.allclose(out_tiled, ref, atol=1e-4, rtol=1e-4), "tiled path mismatch"

    print("KERNEL_OK")
</pallas_src>

<mosaic_0001>
module attributes {stable_mosaic.version = 11 : i64} {
  func.func @_fused_kernel(%arg0: i32, %arg1: memref<1x8x256xf32, #tpu.memory_space<vmem>>, %arg2: memref<8x1xf32, #tpu.memory_space<vmem>>, %arg3: memref<8x1xf32, #tpu.memory_space<vmem>>, %arg4: memref<1x8x256xf32, #tpu.memory_space<vmem>>) attributes {dimension_semantics = [#tpu.dimension_semantics<parallel>], iteration_bounds = array<i64: 2>, scalar_prefetch = 0 : i64, scratch_operands = 0 : i64, tpu.core_type = #tpu.core_type<tc>, window_params = [{transform_indices = @transform_0, window_bounds = array<i64: 1, 8, 256>}, {pipeline_mode = #tpu.pipeline_mode<synchronous>, transform_indices = @transform_1, window_bounds = array<i64: 8, 1>}, {pipeline_mode = #tpu.pipeline_mode<synchronous>, transform_indices = @transform_2, window_bounds = array<i64: 8, 1>}, {transform_indices = @transform_3, window_bounds = array<i64: 1, 8, 256>}]} {
    %c0 = arith.constant 0 : index
    %c0_0 = arith.constant 0 : index
    %c0_1 = arith.constant 0 : index
    %0 = vector.load %arg1[%c0, %c0_0, %c0_1] : memref<1x8x256xf32, #tpu.memory_space<vmem>>, vector<1x8x256xf32>
    %1 = vector.shape_cast %0 : vector<1x8x256xf32> to vector<8x256xf32>
    %cst = arith.constant dense<0.000000e+00> : vector<8xf32>
    %2 = vector.multi_reduction <add>, %1, %cst [1] : vector<8x256xf32> to vector<8xf32>
    %3 = vector.shape_cast %2 : vector<8xf32> to vector<8x1xf32>
    %4 = arith.mulf %1, %1 : vector<8x256xf32>
    %cst_2 = arith.constant dense<0.000000e+00> : vector<8xf32>
    %5 = vector.multi_reduction <add>, %4, %cst_2 [1] : vector<8x256xf32> to vector<8xf32>
    %6 = vector.shape_cast %5 : vector<8xf32> to vector<8x1xf32>
    %cst_3 = arith.constant 3.906250e-03 : f32
    %7 = vector.broadcast %cst_3 : f32 to vector<8x1xf32>
    %8 = arith.mulf %3, %7 : vector<8x1xf32>
    %cst_4 = arith.constant 3.906250e-03 : f32
    %9 = vector.broadcast %cst_4 : f32 to vector<8x1xf32>
    %10 = arith.mulf %6, %9 : vector<8x1xf32>
    %11 = arith.mulf %8, %8 : vector<8x1xf32>
    %12 = arith.subf %10, %11 : vector<8x1xf32>
    %cst_5 = arith.constant 9.99999974E-6 : f32
    %13 = vector.broadcast %cst_5 : f32 to vector<8x1xf32>
    %14 = arith.addf %12, %13 : vector<8x1xf32>
    %15 = math.rsqrt %14 : vector<8x1xf32>
    %c0_6 = arith.constant 0 : index
    %c0_7 = arith.constant 0 : index
    %16 = vector.load %arg2[%c0_6, %c0_7] : memref<8x1xf32, #tpu.memory_space<vmem>>, vector<8x1xf32>
    %17 = arith.mulf %15, %16 : vector<8x1xf32>
    %c0_8 = arith.constant 0 : index
    %c0_9 = arith.constant 0 : index
    %18 = vector.load %arg3[%c0_8, %c0_9] : memref<8x1xf32, #tpu.memory_space<vmem>>, vector<8x1xf32>
    %19 = arith.mulf %8, %17 : vector<8x1xf32>
    %20 = arith.subf %18, %19 : vector<8x1xf32>
    %21 = vector.broadcast %17 : vector<8x1xf32> to vector<8x256xf32>
    %22 = arith.mulf %1, %21 : vector<8x256xf32>
    %23 = vector.broadcast %20 : vector<8x1xf32> to vector<8x256xf32>
    %24 = arith.addf %22, %23 : vector<8x256xf32>
    %25 = arith.negf %24 : vector<8x256xf32>
    %26 = math.exp %25 : vector<8x256xf32>
    %cst_10 = arith.constant 1.000000e+00 : f32
    %27 = vector.broadcast %cst_10 : f32 to vector<8x256xf32>
    %28 = arith.addf %27, %26 : vector<8x256xf32>
    %29 = arith.divf %27, %28 : vector<8x256xf32>
    %30 = arith.mulf %1, %29 : vector<8x256xf32>
    %c0_11 = arith.constant 0 : index
    %c0_12 = arith.constant 0 : index
    %c0_13 = arith.constant 0 : index
    %31 = vector.load %arg4[%c0_11, %c0_12, %c0_13] : memref<1x8x256xf32, #tpu.memory_space<vmem>>, vector<1x8x256xf32>
    %32 = vector.shape_cast %31 : vector<1x8x256xf32> to vector<8x256xf32>
    %33 = vector.shape_cast %30 : vector<8x256xf32> to vector<1x8x256xf32>
    tpu.vector_store %arg4[%c0_11, %c0_12, %c0_13], %33 {strides = array<i32>} : memref<1x8x256xf32, #tpu.memory_space<vmem>>, vector<1x8x256xf32>,
    return
  }
  func.func @transform_0(%arg0: i32) -> (i32, i32, i32) {
    %c0_i32 = arith.constant 0 : i32
    %c0_i32_0 = arith.constant 0 : i32
    %c0_i32_1 = arith.constant 0 : i32
    return %arg0, %c0_i32, %c0_i32_0 : i32, i32, i32
  }
  func.func @transform_1(%arg0: i32) -> (i32, i32) {
    %c0_i32 = arith.constant 0 : i32
    %c0_i32_0 = arith.constant 0 : i32
    %c0_i32_1 = arith.constant 0 : i32
    return %c0_i32, %c0_i32_0 : i32, i32
  }
  func.func @transform_2(%arg0: i32) -> (i32, i32) {
    %c0_i32 = arith.constant 0 : i32
    %c0_i32_0 = arith.constant 0 : i32
    %c0_i32_1 = arith.constant 0 : i32
    return %c0_i32, %c0_i32_0 : i32, i32
  }
  func.func @transform_3(%arg0: i32) -> (i32, i32, i32) {
    %c0_i32 = arith.constant 0 : i32
    %c0_i32_0 = arith.constant 0 : i32
    %c0_i32_1 = arith.constant 0 : i32
    return %arg0, %c0_i32, %c0_i32_0 : i32, i32, i32
  }
}

</mosaic_0001>

<bundles_post_ra>
// kernel: tpu_custom_call.1
= control target key start
LH: loop header
LB: loop body
LE: loop exit
PB: predicated region body
PF: predicated region fallthrough
CT: control target
= control target key end

     0   :  { %8 = vsyncpa [#allocation3], 0  ;;  %s709_s0 = inlined_call_operand.hbm [shape: f32[2,8,256], index: 0, kind: input, shape index: {}]   ;;  %s710_s1 = inlined_call_operand.vmem [shape: f32[8,1], index: 1, kind: input, shape index: {}]   ;;  %s711_s2 = inlined_call_operand.vmem [shape: f32[8,1], index: 2, kind: input, shape index: {}]   ;;  %s712_s3 = inlined_call_operand.hbm [shape: f32[2,8,256], index: 3, kind: output, shape index: {}]  }
   0x1   :  { %10 = vsyncpa [#allocation3 + $0x1], 0 }
   0x2   :  { %11 = vsyncpa [#allocation4], 0 }
   0x3   :  { %13 = vsyncpa [#allocation4 + $0x1], 0  ;;  %s558_s12 = smov 0   ;;  %s560_s13 = smov 0  }
   0x4   :  { %s562_s14 = smov 0   ;;  %s564_s15 = smov 0  }
   0x5 LB: > { %s579_s16 = sadd.s32 4294967295, %s535_s15   ;;  %s362_s17 = sadd.s32 4294967294, %s535_s15   ;;  %s535_s15 = sphi %s564_s15, %s722_s15   ;;  %s531_s14 = sphi %s562_s14, %s721_s14   ;;  %s527_s13 = sphi %s560_s13, %s720_s13   ;;  %s523_s12 = sphi %s558_s12, %s719_s12  }
   0x6   : > { %s583_s18 = sadd.s32 1, %s535_s15   ;;  %s26_s19 = sadd.s32 1, %s531_s14 }
   0x7   : > { %s23_s20 = ssub.s32 %s535_s15, %s583_s18  ;;  %p33_p0 = scmp.ne.s32.totalorder %s531_s14, %s527_s13 }
   0x8   : > { %p24_p1 = scmp.eq.s32.totalorder %s23_s20, 0  ;;  %p34_p2 = scmp.eq.s32.totalorder %s535_s15, 0 }
   0x9   : > { %p39_p3 = scmp.ne.s32.totalorder %s527_s13, %s523_s12  ;;  %p40_p4 = scmp.eq.s32.totalorder %s579_s16, 0 }
   0xa   : > { %s595_s21 = scalar_select %p24_p1, %s531_s14, %s26_s19  }
   0xb   : > { %p597_p5 = por %p34_p2, %p33_p0  ;;  %p601_p6 = por %p40_p4, %p39_p3 }
   0xc   : > { %p105_p7 = scmp.eq.s32.totalorder %s579_s16, 1  ;;  %p111_p8 = scmp.eq.s32.totalorder %s362_s17, 1 }
   0xd   : > { %p392_p10 = scmp.lt.s32.totalorder %s535_s15, 2  ;;  %s137_s26 = sand.u32 1, %s531_s14  }
   0xe   : > { %p608_p11 = por %p105_p7, %p33_p0  ;;  %p612_p12 = por %p111_p8, %p39_p3 }
   0xf   : > { %s378_s27 = sshll.u32 %s535_s15, 4  ;;  %s365_s28 = sshll.u32 %s137_s26, 4 }
  0x10   : > { %s146_s4 = scalar_lea.hbm %s709_s0, %s378_s27  ;;  %s141_s6 = scalar_lea.vmem [#allocation2], %s365_s28 }
  0x11   : > { %s148_s5 = sshll.u32 %s146_s4, 4  ;;  %s150_s7 = sshll.u32 %s141_s6, 4  ;;  %s149_s5 = int_to_ptr.hbm [resolvable:$true] %s148_s5  ;;  %s151_s7 = int_to_ptr.vmem [resolvable:$true] %s150_s7 }
  0x12   : > { %p623_p13 = pnand %p392_p10, %p597_p5  ;;  %p368_p0 = scmp.ge.s32.totalorder %s535_s15, 1 }
  0x13   : > { %p155_p1 = scmp.lt.s32.totalorder %s535_s15, 3  ;;  %s138_s9 = scalar_lea.sflag [#allocation3], %s137_s26 }
  0x14   : > { %s439_s10 = sshra.s32 %s149_s5, 4  ;;  %p443_p3 = pneg %p623_p13  ;;  %s440_s10 = int_to_ptr.hbm [resolvable:$true] %s439_s10 }
  0x15   : > { %s441_s11 = scalar_lea.hbm %s440_s10, 16  ;;  %s446_s20 = scalar_lea.hbm %s709_s0, 32 }
  0x16   : > { %p442_p2 = scmp.ne.s32.totalorder %s440_s10, %s441_s11  ;;  %p447_p5 = scmp.lt.s32.totalorder %s440_s10, %s709_s0 }
  0x17   : > { %p448_p8 = scmp.lt.s32.totalorder %s446_s20, %s441_s11 }
  0x18   : > { %p444_p4 = pnand %p443_p3, %p442_p2 }
  0x19   : > { %p449_p10 = por %p448_p8, %p447_p5 }
  0x1a   : > { %p445_p7 = pneg %p444_p4 }
  0x1c   : > { %p450_p9 = pnand %p449_p10, %p445_p7 }
  0x1e   : > { %453 = shalt.err (!%p450_p9)
}
  0x1f   : > { %387 = dma.hbm_to_vmem [thread:$0]  (!%p623_p13), %s149_s5, 256, %s151_s7, %s138_s9  }
  0x20   : > { %p156_p2 = pnand %p368_p0, %p155_p1 }
  0x21   : > { %s644_s26 = sand.u32 (!%p156_p2), 1, %s527_s13  }
  0x22   : > { %159 = sbr.rel (%p156_p2) target bundleno = 352 (0x160), region = 32  ;;  %s369_s28 = sshll.u32 (!%p156_p2), %s644_s26, 4 }
  0x23   : > { %s162_s29 = scalar_lea.sflag (!%p156_p2), [#allocation3], %s644_s26  ;;  %s165_s30 = scalar_lea.vmem (!%p156_p2), [#allocation2], %s369_s28 }
  0x27   : > { %514 = dma.done.wait (%p601_p6), %s162_s29, 256  }
  0x28   : > { %516 = vsyncadd (%p601_p6), %s162_s29, 4294967040  ;;  %v654_v0 = vld [vmem:[%s165_s30] sm:$0xff]  ;;  %v656_v1 = vld [vmem:[%s165_s30 + $0x8] sm:$0xff]  ;;  %v537_v6 = vmov 0   ;;  %s379_s7 = sshll.u32 %s579_s16, 4  ;;  %s188_s16 = scalar_lea.vmem [#allocation5], %s369_s28 }
  0x29   : > { %v191_v2 = vadd.f32 %v656_v1, %v654_v0  ;;  %v194_v3 = vmul.f32 %v654_v0, %v654_v0  ;;  %v195_v4 = vmul.f32 %v656_v1, %v656_v1  ;;  %427 = vset.pattern.permute.xlu1 %v537_v6  ;;  %428 = vset.pattern.permute.xlu0 %v537_v6  ;;  %v214_v20 = vld [vmem:[%s710_s1] sm:$0xff]  ;;  %s287_s10 = scalar_lea.hbm %s712_s3, %s379_s7  ;;  %s289_s11 = sshll.u32 %s188_s16, 4  ;;  %s290_s11 = int_to_ptr.vmem [resolvable:$true] %s289_s11 }
  0x2a   : > { %v216_v24 = vld [vmem:[%s711_s2] sm:$0xff]  ;;  %s291_s17 = sshll.u32 %s287_s10, 4  ;;  %s276_s19 = scalar_lea.sflag [#allocation4], %s644_s26  ;;  %s292_s17 = int_to_ptr.hbm [resolvable:$true] %s291_s17 }
  0x2b   : > { %192 = vadd.xlane.f32.xlu0 %v191_v2  ;;  %v196_v5 = vadd.f32 %v195_v4, %v194_v3  ;;  %s483_s20 = sshra.s32 %s292_s17, 4  ;;  %s489_s29 = scalar_lea.hbm %s712_s3, 32  ;;  %s484_s20 = int_to_ptr.hbm [resolvable:$true] %s483_s20 }
  0x2c   : > { %s485_s22 = scalar_lea.hbm %s484_s20, 16  ;;  %p490_p0 = scmp.lt.s32.totalorder %s484_s20, %s712_s3 }
  0x2d   : > { %p486_p6 = scmp.ne.s32.totalorder %s484_s20, %s485_s22  ;;  %p491_p1 = scmp.lt.s32.totalorder %s489_s29, %s485_s22 }
  0x2f   : > { %p487_p9 = pnand %p486_p6, %p608_p11  ;;  %p492_p3 = por %p491_p1, %p490_p0 }
  0x31   : > { %p488_p13 = pneg %p487_p9 }
  0x33   : > { %197 = vadd.xlane.f32.xlu0 %v196_v5  ;;  %p493_p4 = pnand %p492_p3, %p488_p13 }
  0x9e   : > { %v193_v7 = vpop.xlane.xlu0 %192 }
  0x9f   : > { %v199_v8 = vmul.f32 0.00390625, %v193_v7 }
  0xa1   : > { %v201_v10 = vmul.f32 %v199_v8, %v199_v8 }
  0xa6   : > { %v198_v9 = vpop.xlane.xlu0 %197 }
  0xa7   : > { %v200_v11 = vmul.f32 0.00390625, %v198_v9 }
  0xa9   : > { %v202_v12 = vsub.f32 %v200_v11, %v201_v10 }
  0xab   : > { %v203_v13 = vadd.f32 1e-05, %v202_v12 }
  0xad   : > { %429 = vrsqrt.f32 %v203_v13  ;;  %vm210_vm1 = vweird.f32 %v203_v13 }
  0xb3   : > { %v430_v14 = vpop.eup %429 }
  0xb4   : > { %v205_v15 = vmul.f32 %v430_v14, %v203_v13  ;;  %vm211_vm0 = vweird.f32 %v430_v14 }
  0xb5   : > { %vm212_vm2 = vmor %vm210_vm1, %vm211_vm0 }
  0xb6   : > { %v206_v16 = vmul.f32 %v430_v14, %v205_v15 }
  0xb8   : > { %v207_v17 = vmul.f32 0.5, %v206_v16 }
  0xba   : > { %v208_v18 = vsub.f32 1.5, %v207_v17 }
  0xbc   : > { %v209_v19 = vmul.f32 %v430_v14, %v208_v18 }
  0xbe   : > { %v213_v21 = vsel %vm212_vm2, %v430_v14, %v209_v19 }
  0xbf   : > { %v215_v22 = vmul.f32 %v214_v20, %v213_v21 }
  0xc1   : > { %221 = vperm.xlu1 %427, %v215_v22   ;;  %v217_v23 = vmul.f32 %v215_v22, %v199_v8 }
  0xc3   : > { %v218_v25 = vsub.f32 %v216_v24, %v217_v23 }
  0xc9   : > { %228 = vperm.xlu1 %427, %v218_v25  }
 0x133   : > { %v222_v26 = vpop.permute.xlu1 %221 }
 0x134   : > { %v224_v27 = vmul.f32 %v222_v26, %v654_v0  ;;  %v225_v28 = vmul.f32 %v222_v26, %v656_v1 }
 0x13b   : > { %v229_v29 = vpop.permute.xlu1 %228 }
 0x13c   : > { %v231_v30 = vadd.f32 %v229_v29, %v224_v27  ;;  %v232_v31 = vadd.f32 %v229_v29, %v225_v28 }
 0x13e   : > { %v371_v32 = vmul.f32 -1.442695, %v231_v30  ;;  %v372_v33 = vmul.f32 -1.442695, %v232_v31 }
 0x140   : > { %431 = vpow2.f32 %v371_v32 }
 0x141   : > { %433 = vpow2.f32 %v372_v33 }
 0x146   : > { %v432_v34 = vpop.eup %431 }
 0x147   : > { %v434_v35 = vpop.eup %433  ;;  %v239_v36 = vadd.f32 1.0, %v432_v34 }
 0x148   : > { %v240_v37 = vadd.f32 1.0, %v434_v35 }
 0x149   : > { %435 = vrcp.f32 %v239_v36  ;;  %v252_v43 = vand.u32 2147483648, %v239_v36  ;;  %v250_v46 = vand.u32 2147483647, %v239_v36  ;;  %vm246_vm5 = vweird.f32 %v239_v36 }
 0x14a   : > { %437 = vrcp.f32 %v240_v37  ;;  %v267_v47 = vand.u32 2147483648, %v240_v37  ;;  %v265_v49 = vand.u32 2147483647, %v240_v37  ;;  %vm261_vm7 = vweird.f32 %v240_v37 }
 0x14b   : > { %v253_v51 = vor.u32 1.1754944e-38, %v252_v43  ;;  %vm251_vm9 = vcmp.eq.f32.partialorder %v250_v46, 8.507059e+37 }
 0x14c   : > { %v268_v53 = vor.u32 1.1754944e-38, %v267_v47  ;;  %vm266_vm10 = vcmp.eq.f32.partialorder %v265_v49, 8.507059e+37 }
 0x14f   : > { %v436_v38 = vpop.eup %435 }
 0x150   : > { %v438_v39 = vpop.eup %437  ;;  %v242_v40 = vmul.f32 %v436_v38, %v239_v36  ;;  %vm247_vm3 = vweird.f32 %v436_v38 }
 0x151   : > { %v257_v41 = vmul.f32 %v438_v39, %v240_v37  ;;  %vm262_vm4 = vweird.f32 %v438_v39  ;;  %vm248_vm6 = vmor %vm246_vm5, %vm247_vm3 }
 0x152   : > { %v243_v42 = vsub.f32 1.0, %v242_v40  ;;  %vm263_vm8 = vmor %vm261_vm7, %vm262_vm4 }
 0x153   : > { %v258_v44 = vsub.f32 1.0, %v257_v41 }
 0x154   : > { %v244_v45 = vmul.f32 %v436_v38, %v243_v42 }
 0x155   : > { %v259_v48 = vmul.f32 %v438_v39, %v258_v44 }
 0x156   : > { %v245_v50 = vadd.f32 %v436_v38, %v244_v45 }
 0x157   : > { %v260_v52 = vadd.f32 %v438_v39, %v259_v48 }
 0x158   : > { %v249_v54 = vsel %vm248_vm6, %v436_v38, %v245_v50 }
 0x159   : > { %v254_v55 = vsel %vm251_vm9, %v253_v51, %v249_v54  ;;  %v264_v56 = vsel %vm263_vm8, %v438_v39, %v260_v52 }
 0x15a   : > { %v269_v57 = vsel %vm266_vm10, %v268_v53, %v264_v56  ;;  %v271_v58 = vmul.f32 %v254_v55, %v654_v0 }
 0x15b   : > { %v272_v59 = vmul.f32 %v269_v57, %v656_v1 }
 0x15c   : > { %273 = vst [vmem:[%s188_s16] sm:$0xff] %v271_v58 }
 0x15d   : > { %274 = vst [vmem:[%s188_s16 + $0x8] sm:$0xff] %v272_v59 }
 0x15e   : > { %496 = shalt.err (!%p493_p4)
}
 0x15f   : > { %382 = dma.vmem_to_hbm [thread:$0]  (%p608_p11), %s290_s11, 256, %s292_s17, %s276_s19  }
 0x160 PF: > { %s303_s26 = sand.u32 1, %s523_s12   ;;  %p718_p7 = scmp.ge.s32.totalorder %s535_s15, 2 }
 0x161   : > { %s304_s4 = scalar_lea.sflag [#allocation4], %s303_s26 }
 0x162   : > { %p389_p5 = pnand %p718_p7, %p612_p12 }
 0x164   : > { %p390_p8 = pneg %p389_p5 }
 0x166   : > { %518 = dma.done.wait (%p390_p8), %s304_s4, 256  }
 0x167   : > { %520 = vsyncadd (%p390_p8), %s304_s4, 4294967040  ;;  %p16_p10 = scmp.ge.s32.totalorder %s583_s18, 4   ;;  %s719_s12 = smov %s527_s13 }
 0x168   : > { %s720_s13 = smov %s531_s14  ;;  %s721_s14 = smov %s595_s21 }
 0x169   : > { %s722_s15 = smov %s583_s18  ;;  %18 = sbr.rel (!%p16_p10) target bundleno = 5 (0x5), region = 77 }
 0x16e   :  { %310 = vsyncpa [#allocation3], 1 }
 0x16f   :  { %312 = vsyncpa [#allocation3 + $0x1], 1 }
 0x170   :  { %313 = vsyncpa [#allocation4], 1 }
 0x171   :  { %315 = vsyncpa [#allocation4 + $0x1], 1 }

</bundles_post_ra>
